<compile_context>
chip_gen: v7x
topology: tpu7x:2x2x1
jax: 0.10.0
libtpu: 0.0.40
codegen_flags: <defaults>
</compile_context>

<pallas_src>
import functools

import jax
import jax.numpy as jnp
from jax.experimental import pallas as pl
from jax.experimental.pallas import tpu as pltpu

_LANE = 128
_SUBLANE = 8


def _round_up(v, m):
    return (v + m - 1) // m * m


def _vmem_capacity_bytes():
    try:
        return int(pltpu.get_tpu_info().vmem_capacity_bytes)
    except Exception:
        return 64 * 1024 * 1024  # conservative fallback (v7x per-TC VMEM)


# --------------------------------------------------------------------------
# Fused kernel: one node tile through the entire MLP stack.
# refs layout: x, w_emb, b_emb, (w_h, b_h) * num_hidden, w_out, b_out, o_ref
# --------------------------------------------------------------------------
def _fused_glnn_kernel(*refs, num_hidden, matmul_dtype):
    x_ref = refs[0]
    o_ref = refs[-1]
    wb = refs[1:-1]

    def dense(h, w_ref, b_ref, relu):
        # Matmul in matmul_dtype (bf16 MXU fast path), f32 accumulate.
        y = jnp.dot(h.astype(matmul_dtype), w_ref[...],
                    preferred_element_type=jnp.float32)
        y = y + b_ref[...]      # bias / ReLU kept in f32 (v5e-safe VPU path)
        if relu:
            y = jnp.maximum(y, 0.0)
        return y

    h = dense(x_ref[...], wb[0], wb[1], relu=True)          # node_emb + ReLU
    idx = 2
    for _ in range(num_hidden):                              # hidden layers
        h = dense(h, wb[idx], wb[idx + 1], relu=True)
        idx += 2
    y = dense(h, wb[idx], wb[idx + 1], relu=False)           # out projection
    o_ref[...] = y.astype(o_ref.dtype)


# --------------------------------------------------------------------------
# Single-layer kernel for the weight-streaming fallback (weights too big to
# stay VMEM-resident as a stack). K is kept whole; f_out and n are tiled.
# --------------------------------------------------------------------------
def _dense_layer_kernel(x_ref, w_ref, b_ref, o_ref, *, relu, matmul_dtype):
    y = jnp.dot(x_ref[...].astype(matmul_dtype), w_ref[...],
                preferred_element_type=jnp.float32)
    y = y + b_ref[...]
    if relu:
        y = jnp.maximum(y, 0.0)
    o_ref[...] = y.astype(o_ref.dtype)


# --------------------------------------------------------------------------
# Parameter handling
# --------------------------------------------------------------------------
def init_glnn_params(key, num_layers, in_features, out_features, dim_hidden,
                     dtype=jnp.float32):
    """PyTorch-style params: weights stored as (out, in)."""
    num_hidden = num_layers - 1
    params = {}
    keys = jax.random.split(key, 2 * (num_hidden + 2))
    ki = 0

    def linear_init(k_w, k_b, fan_in, fan_out):
        bound = 1.0 / jnp.sqrt(jnp.asarray(fan_in, dtype=jnp.float32))
        w = jax.random.uniform(k_w, (fan_out, fan_in), dtype, -bound, bound)
        b = jax.random.uniform(k_b, (fan_out,), dtype, -bound, bound)
        return w, b

    params["emb_w"], params["emb_b"] = linear_init(
        keys[ki], keys[ki + 1], in_features, dim_hidden); ki += 2
    params["hidden"] = []
    for _ in range(num_hidden):
        w, b = linear_init(keys[ki], keys[ki + 1], dim_hidden, dim_hidden)
        ki += 2
        params["hidden"].append((w, b))
    params["out_w"], params["out_b"] = linear_init(
        keys[ki], keys[ki + 1], dim_hidden, out_features); ki += 2
    return params


def prepare_glnn_pallas_params(params, matmul_dtype=jnp.bfloat16):
    """Transpose to (F_in, F_out) once; zero-pad only the INTERNAL f_out
    (lane) axes to 128. The input feature axis and the final out_features
    stay unpadded so x and the logits never get padded/copied in HBM."""
    raw = [(params["emb_w"], params["emb_b"])]
    raw += list(params["hidden"])
    raw += [(params["out_w"], params["out_b"])]

    layers = []
    prev_width = params["emb_w"].shape[1]          # raw in_features
    for li, (w, b) in enumerate(raw):
        f_out, f_in = w.shape
        last = li == len(raw) - 1
        out_width = f_out if last else _round_up(f_out, _LANE)
        w_p = jnp.zeros((prev_width, out_width), matmul_dtype)
        w_p = w_p.at[:f_in, :f_out].set(w.T.astype(matmul_dtype))
        b_p = jnp.zeros((1, out_width), jnp.float32)
        b_p = b_p.at[0, :f_out].set(b.astype(jnp.float32))
        layers.append((w_p, b_p))
        prev_width = out_width

    return {
        "layers": layers,
        "in_features": params["emb_w"].shape[1],
        "out_features": params["out_w"].shape[0],
        "matmul_dtype": matmul_dtype,
    }


# --------------------------------------------------------------------------
# Weight-streaming fallback: one pallas_call per layer, f_out-tiled weights.
# --------------------------------------------------------------------------
def _streaming_glnn(prepared, x, vmem_budget, vmem_cap_limit):
    layers = prepared["layers"]
    matmul_dtype = prepared["matmul_dtype"]
    n = x.shape[0]

    h = x
    for li, (w, b) in enumerate(layers):
        last = li == len(layers) - 1
        k_dim, f_out = w.shape
        tile_f = f_out if f_out <= 512 else 512
        out_dtype = jnp.float32 if last else matmul_dtype

        x_item = h.dtype.itemsize
        w_item = w.dtype.itemsize

        def est_s(t, tf):
            return (2 * t * k_dim * x_item          # streamed activation tiles
                    + 2 * k_dim * tf * w_item        # streamed weight tiles
                    + 2 * tf * 4                     # bias tiles
                    + 2 * t * tf * 4                 # out tiles
                    + 2 * t * tf * (4 + w_item))     # live f32 acc + cast temp

        tile_n_s = _round_up(min(512, _round_up(n, _SUBLANE)), _SUBLANE)
        while tile_n_s > _SUBLANE and est_s(tile_n_s, tile_f) > vmem_budget:
            tile_n_s = _round_up(tile_n_s // 2, _SUBLANE)

        vmem_limit = int(min(max(est_s(tile_n_s, tile_f) * 5 // 4,
                                 4 * 1024 * 1024), vmem_cap_limit))
        kernel = functools.partial(_dense_layer_kernel, relu=not last,
                                   matmul_dtype=matmul_dtype)
        h = pl.pallas_call(
            kernel,
            out_shape=jax.ShapeDtypeStruct((n, f_out), out_dtype),
            grid_spec=pltpu.PrefetchScalarGridSpec(
                num_scalar_prefetch=0,
                grid=(pl.cdiv(n, tile_n_s), pl.cdiv(f_out, tile_f)),
                in_specs=[pl.BlockSpec((tile_n_s, k_dim), lambda i, j: (i, 0)),
                          pl.BlockSpec((k_dim, tile_f), lambda i, j: (0, j)),
                          pl.BlockSpec((1, tile_f), lambda i, j: (0, j))],
                out_specs=pl.BlockSpec((tile_n_s, tile_f),
                                       lambda i, j: (i, j)),
            ),
            compiler_params=pltpu.CompilerParams(
                dimension_semantics=("parallel", "parallel"),
                vmem_limit_bytes=vmem_limit,
            ),
        )(h, w, b)
    return h  # last layer is unpadded -> already (n, out_features) f32


# --------------------------------------------------------------------------
# Wrapper: single fused pallas_call, node-tiled grid.
# --------------------------------------------------------------------------
def fused_glnn_pallas(prepared, x, *, tile_n=2048, force_streaming=False):
    layers = prepared["layers"]
    matmul_dtype = prepared["matmul_dtype"]
    out_features = prepared["out_features"]
    num_hidden = len(layers) - 2

    n, f_in = x.shape
    assert f_in == prepared["in_features"]

    w_bytes = sum(w.size * w.dtype.itemsize + b.size * b.dtype.itemsize
                  for w, b in layers)
    mm_item = jnp.dtype(matmul_dtype).itemsize
    x_item = x.dtype.itemsize
    max_width = max([f_in] + [w.shape[1] for w, _ in layers])

    # Generation-aware VMEM budget (~92 MiB on 128-MiB v5e/v6e, ~46 MiB on
    # 64-MiB v7x) and compiler limit cap.
    vmem_cap = _vmem_capacity_bytes()
    vmem_budget = int(vmem_cap * 0.72)
    vmem_cap_limit = int(vmem_cap * 0.82)

    def est(t, w_buffers, x_buffers):
        return (x_buffers * t * f_in * x_item            # streamed x tiles
                + 2 * t * out_features * 4               # streamed logits tiles
                + 2 * t * max_width * (4 + mm_item)      # live f32 act + cast
                + w_buffers * w_bytes)                   # resident params

    def pick_tile(w_buffers, x_buffers):
        t = _round_up(min(tile_n, _round_up(n, _SUBLANE)), _SUBLANE)
        if n > 4 * _SUBLANE:       # >=2 grid steps so both v7x TCs get work
            t = min(t, _round_up(pl.cdiv(n, 2), _SUBLANE))
        while t > _SUBLANE and est(t, w_buffers, x_buffers) > vmem_budget:
            t = _round_up(t // 2, _SUBLANE)
        return t, est(t, w_buffers, x_buffers) <= vmem_budget

    t_buf, fit_buf = pick_tile(1, 3)     # single-buffered weights, x x3
    t_plain, fit_plain = pick_tile(2, 2)  # default double buffering

    if force_streaming or not fit_buf:
        return _streaming_glnn(prepared, x, vmem_budget, vmem_cap_limit)

    flat_wb = [a for pair in layers for a in pair]
    kernel = functools.partial(_fused_glnn_kernel, num_hidden=num_hidden,
                               matmul_dtype=matmul_dtype)

    def build(t, buffered):
        x_kw = {"pipeline_mode": pl.Buffered(3)} if buffered else {}
        w_kw = {"pipeline_mode": pl.Buffered(1)} if buffered else {}
        in_specs = [pl.BlockSpec((t, f_in), lambda i: (i, 0), **x_kw)]
        for w, b in layers:
            in_specs.append(pl.BlockSpec(w.shape, lambda i: (0, 0), **w_kw))
            in_specs.append(pl.BlockSpec(b.shape, lambda i: (0, 0), **w_kw))
        wbuf, xbuf = (1, 3) if buffered else (2, 2)
        vmem_limit = int(min(max(est(t, wbuf, xbuf) * 5 // 4, 4 * 1024 * 1024),
                             vmem_cap_limit))
        return pl.pallas_call(
            kernel,
            out_shape=jax.ShapeDtypeStruct((n, out_features), jnp.float32),
            grid_spec=pltpu.PrefetchScalarGridSpec(
                num_scalar_prefetch=0,
                grid=(pl.cdiv(n, t),),
                in_specs=in_specs,
                out_specs=pl.BlockSpec((t, out_features), lambda i: (i, 0)),
            ),
            compiler_params=pltpu.CompilerParams(
                dimension_semantics=("parallel",),
                vmem_limit_bytes=vmem_limit,
            ),
        )

    if hasattr(pl, "Buffered"):
        try:
            return build(t_buf, buffered=True)(x, *flat_wb)
        except Exception:
            pass  # pipeline_mode unsupported on this build -> default buffers
    if not fit_plain:
        return _streaming_glnn(prepared, x, vmem_budget, vmem_cap_limit)
    return build(t_plain, buffered=False)(x, *flat_wb)


def glnn_forward(prepared, x, **kwargs):
    """Matches GLNN.forward: returns (None, logits)."""
    return (None, fused_glnn_pallas(prepared, x, **kwargs))


def glnn_reference(params, x):
    h = jnp.maximum(x @ params["emb_w"].T + params["emb_b"], 0.0)
    for w, b in params["hidden"]:
        h = jnp.maximum(h @ w.T + b, 0.0)
    return h @ params["out_w"].T + params["out_b"]


if __name__ == "__main__":
    # Small, forward-consistent shapes.
    num_layers = 3          # -> 2 hidden layers
    in_features = 16
    dim_hidden = 32
    out_features = 4
    num_nodes = 8

    key = jax.random.PRNGKey(0)
    k_param, k_x = jax.random.split(key)
    params = init_glnn_params(k_param, num_layers, in_features, out_features,
                              dim_hidden)
    x = jax.random.normal(k_x, (num_nodes, in_features), dtype=jnp.float32)
    ref = glnn_reference(params, x)

    # f32 matmul path (bit-accurate semantics of the PyTorch module).
    prepared_f32 = prepare_glnn_pallas_params(params, matmul_dtype=jnp.float32)
    none_out, logits = glnn_forward(prepared_f32, x)
    logits = jax.block_until_ready(logits)
    assert none_out is None
    assert logits.shape == (num_nodes, out_features)
    assert jnp.allclose(logits, ref, atol=1e-4, rtol=1e-4)

    # Default path: bf16 MXU inputs, f32 accumulation.
    prepared_bf16 = prepare_glnn_pallas_params(params)
    _, logits_bf16 = glnn_forward(prepared_bf16, x)
    logits_bf16 = jax.block_until_ready(logits_bf16)
    assert logits_bf16.shape == (num_nodes, out_features)
    assert jnp.allclose(logits_bf16, ref, atol=5e-2, rtol=5e-2)

    # Weight-streaming fallback path (forced, to exercise it).
    _, logits_stream = glnn_forward(prepared_f32, x, force_streaming=True)
    logits_stream = jax.block_until_ready(logits_stream)
    assert jnp.allclose(logits_stream, ref, atol=1e-4, rtol=1e-4)

    print("KERNEL_OK")
</pallas_src>

<mosaic_0001>
module attributes {stable_mosaic.version = 11 : i64} {
  func.func @_fused_glnn_kernel(%arg0: i32, %arg1: memref<8x16xf32, #tpu.memory_space<vmem>>, %arg2: memref<16x128xf32, #tpu.memory_space<vmem>>, %arg3: memref<1x128xf32, #tpu.memory_space<vmem>>, %arg4: memref<128x128xf32, #tpu.memory_space<vmem>>, %arg5: memref<1x128xf32, #tpu.memory_space<vmem>>, %arg6: memref<128x128xf32, #tpu.memory_space<vmem>>, %arg7: memref<1x128xf32, #tpu.memory_space<vmem>>, %arg8: memref<128x4xf32, #tpu.memory_space<vmem>>, %arg9: memref<1x4xf32, #tpu.memory_space<vmem>>, %arg10: memref<8x4xf32, #tpu.memory_space<vmem>>) attributes {dimension_semantics = [#tpu.dimension_semantics<parallel>], iteration_bounds = array<i64: 1>, scalar_prefetch = 0 : i64, scratch_operands = 0 : i64, tpu.core_type = #tpu.core_type<tc>, window_params = [{transform_indices = @transform_0, window_bounds = array<i64: 8, 16>}, {pipeline_mode = #tpu.pipeline_mode<synchronous>, transform_indices = @transform_1, window_bounds = array<i64: 16, 128>}, {pipeline_mode = #tpu.pipeline_mode<synchronous>, transform_indices = @transform_2, window_bounds = array<i64: 1, 128>}, {pipeline_mode = #tpu.pipeline_mode<synchronous>, transform_indices = @transform_3, window_bounds = array<i64: 128, 128>}, {pipeline_mode = #tpu.pipeline_mode<synchronous>, transform_indices = @transform_4, window_bounds = array<i64: 1, 128>}, {pipeline_mode = #tpu.pipeline_mode<synchronous>, transform_indices = @transform_5, window_bounds = array<i64: 128, 128>}, {pipeline_mode = #tpu.pipeline_mode<synchronous>, transform_indices = @transform_6, window_bounds = array<i64: 1, 128>}, {pipeline_mode = #tpu.pipeline_mode<synchronous>, transform_indices = @transform_7, window_bounds = array<i64: 128, 4>}, {pipeline_mode = #tpu.pipeline_mode<synchronous>, transform_indices = @transform_8, window_bounds = array<i64: 1, 4>}, {transform_indices = @transform_9, window_bounds = array<i64: 8, 4>}]} {
    %c0 = arith.constant 0 : index
    %c0_0 = arith.constant 0 : index
    %0 = vector.load %arg1[%c0, %c0_0] : memref<8x16xf32, #tpu.memory_space<vmem>>, vector<8x16xf32>
    %c0_1 = arith.constant 0 : index
    %c0_2 = arith.constant 0 : index
    %1 = vector.load %arg2[%c0_1, %c0_2] : memref<16x128xf32, #tpu.memory_space<vmem>>, vector<16x128xf32>
    %cst = arith.constant dense<0.000000e+00> : vector<8x128xf32>
    %2 = tpu.matmul %0, %1, %cst {dimension_numbers = #tpu.dot_dimension_numbers<[1], [0], [0], [1], [0, 0, 1, 1], [], []>} : vector<8x16xf32>, vector<16x128xf32>, vector<8x128xf32> -> vector<8x128xf32>
    %c0_3 = arith.constant 0 : index
    %c0_4 = arith.constant 0 : index
    %3 = vector.load %arg3[%c0_3, %c0_4] : memref<1x128xf32, #tpu.memory_space<vmem>>, vector<1x128xf32>
    %4 = vector.broadcast %3 : vector<1x128xf32> to vector<8x128xf32>
    %5 = arith.addf %2, %4 : vector<8x128xf32>
    %cst_5 = arith.constant 0.000000e+00 : f32
    %6 = vector.broadcast %cst_5 : f32 to vector<8x128xf32>
    %7 = arith.maximumf %5, %6 : vector<8x128xf32>
    %c0_6 = arith.constant 0 : index
    %c0_7 = arith.constant 0 : index
    %8 = vector.load %arg4[%c0_6, %c0_7] : memref<128x128xf32, #tpu.memory_space<vmem>>, vector<128x128xf32>
    %cst_8 = arith.constant dense<0.000000e+00> : vector<8x128xf32>
    %9 = tpu.matmul %7, %8, %cst_8 {dimension_numbers = #tpu.dot_dimension_numbers<[1], [0], [0], [1], [0, 0, 1, 1], [], []>} : vector<8x128xf32>, vector<128x128xf32>, vector<8x128xf32> -> vector<8x128xf32>
    %c0_9 = arith.constant 0 : index
    %c0_10 = arith.constant 0 : index
    %10 = vector.load %arg5[%c0_9, %c0_10] : memref<1x128xf32, #tpu.memory_space<vmem>>, vector<1x128xf32>
    %11 = vector.broadcast %10 : vector<1x128xf32> to vector<8x128xf32>
    %12 = arith.addf %9, %11 : vector<8x128xf32>
    %cst_11 = arith.constant 0.000000e+00 : f32
    %13 = vector.broadcast %cst_11 : f32 to vector<8x128xf32>
    %14 = arith.maximumf %12, %13 : vector<8x128xf32>
    %c0_12 = arith.constant 0 : index
    %c0_13 = arith.constant 0 : index
    %15 = vector.load %arg6[%c0_12, %c0_13] : memref<128x128xf32, #tpu.memory_space<vmem>>, vector<128x128xf32>
    %cst_14 = arith.constant dense<0.000000e+00> : vector<8x128xf32>
    %16 = tpu.matmul %14, %15, %cst_14 {dimension_numbers = #tpu.dot_dimension_numbers<[1], [0], [0], [1], [0, 0, 1, 1], [], []>} : vector<8x128xf32>, vector<128x128xf32>, vector<8x128xf32> -> vector<8x128xf32>
    %c0_15 = arith.constant 0 : index
    %c0_16 = arith.constant 0 : index
    %17 = vector.load %arg7[%c0_15, %c0_16] : memref<1x128xf32, #tpu.memory_space<vmem>>, vector<1x128xf32>
    %18 = vector.broadcast %17 : vector<1x128xf32> to vector<8x128xf32>
    %19 = arith.addf %16, %18 : vector<8x128xf32>
    %cst_17 = arith.constant 0.000000e+00 : f32
    %20 = vector.broadcast %cst_17 : f32 to vector<8x128xf32>
    %21 = arith.maximumf %19, %20 : vector<8x128xf32>
    %c0_18 = arith.constant 0 : index
    %c0_19 = arith.constant 0 : index
    %22 = vector.load %arg8[%c0_18, %c0_19] : memref<128x4xf32, #tpu.memory_space<vmem>>, vector<128x4xf32>
    %cst_20 = arith.constant dense<0.000000e+00> : vector<8x4xf32>
    %23 = tpu.matmul %21, %22, %cst_20 {dimension_numbers = #tpu.dot_dimension_numbers<[1], [0], [0], [1], [0, 0, 1, 1], [], []>} : vector<8x128xf32>, vector<128x4xf32>, vector<8x4xf32> -> vector<8x4xf32>
    %c0_21 = arith.constant 0 : index
    %c0_22 = arith.constant 0 : index
    %24 = vector.load %arg9[%c0_21, %c0_22] : memref<1x4xf32, #tpu.memory_space<vmem>>, vector<1x4xf32>
    %25 = vector.broadcast %24 : vector<1x4xf32> to vector<8x4xf32>
    %26 = arith.addf %23, %25 : vector<8x4xf32>
    %c0_23 = arith.constant 0 : index
    %c0_24 = arith.constant 0 : index
    %27 = vector.load %arg10[%c0_23, %c0_24] : memref<8x4xf32, #tpu.memory_space<vmem>>, vector<8x4xf32>
    tpu.vector_store %arg10[%c0_23, %c0_24], %26 {strides = array<i32>} : memref<8x4xf32, #tpu.memory_space<vmem>>, vector<8x4xf32>,
    return
  }
  func.func @transform_0(%arg0: i32) -> (i32, i32) {
    %c0_i32 = arith.constant 0 : i32
    %c0_i32_0 = arith.constant 0 : i32
    return %arg0, %c0_i32 : i32, i32
  }
  func.func @transform_1(%arg0: i32) -> (i32, i32) {
    %c0_i32 = arith.constant 0 : i32
    %c0_i32_0 = arith.constant 0 : i32
    %c0_i32_1 = arith.constant 0 : i32
    return %c0_i32, %c0_i32_0 : i32, i32
  }
  func.func @transform_2(%arg0: i32) -> (i32, i32) {
    %c0_i32 = arith.constant 0 : i32
    %c0_i32_0 = arith.constant 0 : i32
    %c0_i32_1 = arith.constant 0 : i32
    return %c0_i32, %c0_i32_0 : i32, i32
  }
  func.func @transform_3(%arg0: i32) -> (i32, i32) {
    %c0_i32 = arith.constant 0 : i32
    %c0_i32_0 = arith.constant 0 : i32
    %c0_i32_1 = arith.constant 0 : i32
    return %c0_i32, %c0_i32_0 : i32, i32
  }
  func.func @transform_4(%arg0: i32) -> (i32, i32) {
    %c0_i32 = arith.constant 0 : i32
    %c0_i32_0 = arith.constant 0 : i32
    %c0_i32_1 = arith.constant 0 : i32
    return %c0_i32, %c0_i32_0 : i32, i32
  }
  func.func @transform_5(%arg0: i32) -> (i32, i32) {
    %c0_i32 = arith.constant 0 : i32
    %c0_i32_0 = arith.constant 0 : i32
    %c0_i32_1 = arith.constant 0 : i32
    return %c0_i32, %c0_i32_0 : i32, i32
  }
  func.func @transform_6(%arg0: i32) -> (i32, i32) {
    %c0_i32 = arith.constant 0 : i32
    %c0_i32_0 = arith.constant 0 : i32
    %c0_i32_1 = arith.constant 0 : i32
    return %c0_i32, %c0_i32_0 : i32, i32
  }
  func.func @transform_7(%arg0: i32) -> (i32, i32) {
    %c0_i32 = arith.constant 0 : i32
    %c0_i32_0 = arith.constant 0 : i32
    %c0_i32_1 = arith.constant 0 : i32
    return %c0_i32, %c0_i32_0 : i32, i32
  }
  func.func @transform_8(%arg0: i32) -> (i32, i32) {
    %c0_i32 = arith.constant 0 : i32
    %c0_i32_0 = arith.constant 0 : i32
    %c0_i32_1 = arith.constant 0 : i32
    return %c0_i32, %c0_i32_0 : i32, i32
  }
  func.func @transform_9(%arg0: i32) -> (i32, i32) {
    %c0_i32 = arith.constant 0 : i32
    %c0_i32_0 = arith.constant 0 : i32
    return %arg0, %c0_i32 : i32, i32
  }
}

</mosaic_0001>

<bundles_post_ra>
// kernel: tpu_custom_call.1
= control target key start
LH: loop header
LB: loop body
LE: loop exit
PB: predicated region body
PF: predicated region fallthrough
CT: control target
= control target key end

     0   :  { %14 = vsyncpa [#allocation3], 0  ;;  %s963_s0 = inlined_call_operand.vmem [shape: f32[8,16], index: 0, kind: input, shape index: {}]   ;;  %s964_s1 = inlined_call_operand.hbm [shape: f32[16,128], index: 1, kind: input, shape index: {}]   ;;  %s965_s2 = inlined_call_operand.vmem [shape: f32[1,128], index: 2, kind: input, shape index: {}]   ;;  %s966_s3 = inlined_call_operand.vmem [shape: f32[128,128], index: 3, kind: input, shape index: {}]   ;;  %s967_s4 = inlined_call_operand.vmem [shape: f32[1,128], index: 4, kind: input, shape index: {}]   ;;  %s968_s5 = inlined_call_operand.hbm [shape: f32[128,128], index: 5, kind: input, shape index: {}]   ;;  %s969_s6 = inlined_call_operand.vmem [shape: f32[1,128], index: 6, kind: input, shape index: {}]   ;;  %s970_s7 = inlined_call_operand.vmem [shape: f32[128,4], index: 7, kind: input, shape index: {}]   ;;  %s971_s8 = inlined_call_operand.vmem [shape: f32[1,4], index: 8, kind: input, shape index: {}]   ;;  %s972_s9 = inlined_call_operand.vmem [shape: f32[8,4], index: 9, kind: output, shape index: {}]  }
   0x1   :  { %15 = vsyncpa [#allocation5], 0  ;;  %s735_s30 = smov [#allocation2]   ;;  %s687_s13 = scalar_lea.hbm %s964_s1, 256 }
   0x2   :  { %s23_s10 = sshll.u32 %s735_s30, 4  ;;  %p688_p0 = scmp.ne.s32.totalorder %s964_s1, %s687_s13  ;;  %s24_s10 = int_to_ptr.vmem [resolvable:$true] %s23_s10 }
   0x3   :  { %p691_p1 = scmp.lt.u32.totalorder %s687_s13, %s964_s1 }
   0x5   :  { %p693_p2 = pnand %p691_p1, %p688_p0 }
   0x7   :  { %696 = shalt.err (!%p693_p2)
}
   0x8   :  { %s697_s18 = scalar_lea.vmem %s24_s10, 256  ;;  %p702_p4 = scmp.lt.s32.totalorder %s24_s10, %s24_s10 }
   0x9   :  { %p698_p3 = scmp.ne.s32.totalorder %s24_s10, %s697_s18  ;;  %p703_p5 = scmp.lt.s32.totalorder %s697_s18, %s697_s18 }
   0xb   :  { %p704_p6 = por %p703_p5, %p702_p4 }
   0xd   :  { %p705_p7 = pnand %p704_p6, %p698_p3 }
   0xf   :  { %708 = shalt.err (!%p705_p7)
}
  0x10   :  { %s736_s19 = smov 128   ;;  %s737_s20 = smov 8  }
  0x11   :  { %29 = dma.hbm_to_vmem [thread:$0]  %s964_s1, 256, %s24_s10, [#allocation3], %s736_s19, %s736_s19, %s737_s20  }
  0x12   :  { %s738_s23 = smov [#allocation4]   ;;  %s709_s27 = scalar_lea.hbm %s968_s5, 2048 }
  0x13   :  { %s41_s24 = sshll.u32 %s738_s23, 4  ;;  %p710_p8 = scmp.ne.s32.totalorder %s968_s5, %s709_s27  ;;  %s42_s24 = int_to_ptr.vmem [resolvable:$true] %s41_s24 }
  0x14   :  { %p713_p9 = scmp.lt.u32.totalorder %s709_s27, %s968_s5 }
  0x16   :  { %p715_p10 = pnand %p713_p9, %p710_p8 }
  0x18   :  { %718 = shalt.err (!%p715_p10)
}
  0x19   :  { %s719_s12 = scalar_lea.vmem %s42_s24, 2048  ;;  %p724_p12 = scmp.lt.s32.totalorder %s42_s24, %s42_s24 }
  0x1a   :  { %p720_p11 = scmp.ne.s32.totalorder %s42_s24, %s719_s12  ;;  %p725_p13 = scmp.lt.s32.totalorder %s719_s12, %s719_s12 }
  0x1c   :  { %p726_p0 = por %p725_p13, %p724_p12 }
  0x1e   :  { %p727_p1 = pnand %p726_p0, %p720_p11 }
  0x20   :  { %730 = shalt.err (!%p727_p1)
}
  0x21   :  { %47 = dma.hbm_to_vmem [thread:$0]  %s968_s5, 2048, %s42_s24, [#allocation5], %s736_s19, %s736_s19, %s737_s20  }
  0x22   :  { %731 = dma.done.wait [#allocation3], 256  }
  0x23   :  { %732 = vsyncadd [#allocation3], 4294967040 }
  0x24   :  { %733 = dma.done.wait [#allocation5], 2048  }
  0x25   :  { %734 = vsyncadd [#allocation5], 4294965248  ;;  %v739_v0 = vmov 0.0|0.0   ;;  %vm740_vm0 = vmmov 0   ;;  %v741_v1 = vmov 0.0   ;;  %v61_v2 = vld [vmem:[#allocation2] sm:$0xff] }
  0x26   :  { %605 = vmatprep.subr.bf16.mxu0 %v739_v0  ;;  %497 = vmatprep.mubr.msk.f32.mxu0 %vm740_vm0, %v741_v1  ;;  %v62_v3 = vld [vmem:[#allocation2 + $0x8] sm:$0xff]  ;;  %v145_v5 = vld [vmem:[%s966_s3] sm:$0xff]  ;;  %v147_v7 = vld [vmem:[%s966_s3 + $0x10] sm:$0xff]  ;;  %vm70_vm1 = vcmask 130048   ;;  %vm426_vm2 = vcmask 31744  }
  0x27   :  { %608 = vmatprep.subr.bf16.mxu1 %v739_v0  ;;  %532 = vmatprep.mubr.msk.f32.mxu1 %vm740_vm0, %v741_v1  ;;  %v606_v4 = vpack.c.bf16 %v62_v3, %v61_v2  ;;  %v146_v6 = vld [vmem:[%s966_s3 + $0x8] sm:$0xff]  ;;  %v148_v9 = vld [vmem:[%s966_s3 + $0x18] sm:$0xff]  ;;  %v60_v10 = vld [vmem:[%s963_s0] sm:$0xff] }
  0x28   :  { %v609_v8 = vpack.c.bf16 %v146_v6, %v145_v5  ;;  %v612_v11 = vpack.c.bf16 %v148_v9, %v147_v7  ;;  %v149_v12 = vld [vmem:[%s966_s3 + $0x20] sm:$0xff]  ;;  %v150_v13 = vld [vmem:[%s966_s3 + $0x28] sm:$0xff]  ;;  %v151_v15 = vld [vmem:[%s966_s3 + $0x30] sm:$0xff] }
  0x29   :  { %607 = vmatpush3.bf16.msra.mxu0 %v606_v4  ;;  %v615_v14 = vpack.c.bf16 %v150_v13, %v149_v12  ;;  %v152_v16 = vld [vmem:[%s966_s3 + $0x38] sm:$0xff]  ;;  %v153_v18 = vld [vmem:[%s966_s3 + $0x40] sm:$0xff]  ;;  %v154_v19 = vld [vmem:[%s966_s3 + $0x48] sm:$0xff] }
  0x2a   :  { %610 = vmatpush3.bf16.msra.mxu1 %v609_v8  ;;  %632 = vmatprep.subr.bf16.mxu0 %v739_v0  ;;  %v618_v17 = vpack.c.bf16 %v152_v16, %v151_v15  ;;  %v621_v20 = vpack.c.bf16 %v154_v19, %v153_v18  ;;  %v155_v21 = vld [vmem:[%s966_s3 + $0x50] sm:$0xff]  ;;  %v156_v22 = vld [vmem:[%s966_s3 + $0x58] sm:$0xff]  ;;  %v157_v24 = vld [vmem:[%s966_s3 + $0x60] sm:$0xff] }
  0x2b   :  { %611 = vmatprep.subr.bf16.mxu1 %v739_v0  ;;  %v624_v23 = vpack.c.bf16 %v156_v22, %v155_v21  ;;  %v158_v25 = vld [vmem:[%s966_s3 + $0x68] sm:$0xff]  ;;  %v159_v27 = vld [vmem:[%s966_s3 + $0x70] sm:$0xff]  ;;  %v160_v28 = vld [vmem:[%s966_s3 + $0x78] sm:$0xff] }
  0x2c   :  { %498 = vmatmul.mubr.msk.f32.vlgmr.msra.gmra.mrb[0].mxu0 %vm70_vm1, %v60_v10  ;;  %v627_v26 = vpack.c.bf16 %v158_v25, %v157_v24  ;;  %v630_v29 = vpack.c.bf16 %v160_v28, %v159_v27  ;;  %v239_v30 = vld [vmem:[#allocation4] sm:$0xff]  ;;  %v240_v31 = vld [vmem:[#allocation4 + $0x8] sm:$0xff]  ;;  %v241_v32 = vld [vmem:[#allocation4 + $0x10] sm:$0xff] }
  0x2d   :  { %567 = vmatprep.mubr.msk.f32.mxu0 %vm740_vm0, %v741_v1  ;;  %v633_v33 = vpack.c.bf16 %v240_v31, %v239_v30  ;;  %v242_v34 = vld [vmem:[#allocation4 + $0x18] sm:$0xff]  ;;  %v243_v36 = vld [vmem:[#allocation4 + $0x20] sm:$0xff]  ;;  %v244_v37 = vld [vmem:[#allocation4 + $0x28] sm:$0xff] }
  0x2e   :  { %613 = vmatpush3.bf16.msra.mxu1 %v612_v11  ;;  %v636_v35 = vpack.c.bf16 %v242_v34, %v241_v32  ;;  %v639_v38 = vpack.c.bf16 %v244_v37, %v243_v36  ;;  %v245_v39 = vld [vmem:[#allocation4 + $0x30] sm:$0xff]  ;;  %v246_v40 = vld [vmem:[#allocation4 + $0x38] sm:$0xff]  ;;  %v247_v42 = vld [vmem:[#allocation4 + $0x40] sm:$0xff] }
  0x2f   :  { %614 = vmatprep.subr.bf16.mxu1 %v739_v0  ;;  %634 = vmatpush3.bf16.msra.mxu0 %v633_v33  ;;  %v642_v41 = vpack.c.bf16 %v246_v40, %v245_v39  ;;  %v248_v43 = vld [vmem:[#allocation4 + $0x48] sm:$0xff]  ;;  %v249_v45 = vld [vmem:[#allocation4 + $0x50] sm:$0xff]  ;;  %v250_v46 = vld [vmem:[#allocation4 + $0x58] sm:$0xff] }
  0x30   :  { %635 = vmatprep.subr.bf16.mxu0 %v739_v0  ;;  %v645_v44 = vpack.c.bf16 %v248_v43, %v247_v42  ;;  %v648_v47 = vpack.c.bf16 %v250_v46, %v249_v45  ;;  %v251_v48 = vld [vmem:[#allocation4 + $0x60] sm:$0xff]  ;;  %v252_v49 = vld [vmem:[#allocation4 + $0x68] sm:$0xff]  ;;  %v434_v51 = vld [vmem:[%s965_s2] ss:$0 sm:$0xff] }
  0x31   :  { %v651_v50 = vpack.c.bf16 %v252_v49, %v251_v48  ;;  %v253_v56 = vld [vmem:[#allocation4 + $0x70] sm:$0xff]  ;;  %v254_v57 = vld [vmem:[#allocation4 + $0x78] sm:$0xff]  ;;  %v335_v61 = vld [vmem:[%s970_s7 + $0x10] sm:$0xff] }
  0x32   :  { %616 = vmatpush3.bf16.msra.mxu1 %v615_v14  ;;  %v654_v58 = vpack.c.bf16 %v254_v57, %v253_v56  ;;  %v333_v59 = vld [vmem:[%s970_s7] sm:$0xff]  ;;  %v334_v60 = vld [vmem:[%s970_s7 + $0x8] sm:$0xff]  ;;  %v336_v63 = vld [vmem:[%s970_s7 + $0x18] sm:$0xff] }
  0x33   :  { %617 = vmatprep.subr.bf16.mxu1 %v739_v0  ;;  %637 = vmatpush3.bf16.msra.mxu0 %v636_v35  ;;  %v657_v62 = vpack.c.bf16 %v334_v60, %v333_v59  ;;  %v337_v2 = vld [vmem:[%s970_s7 + $0x20] sm:$0xff]  ;;  %v338_v3 = vld [vmem:[%s970_s7 + $0x28] sm:$0xff]  ;;  %v339_v5 = vld [vmem:[%s970_s7 + $0x30] sm:$0xff] }
  0x34   :  { %638 = vmatprep.subr.bf16.mxu0 %v739_v0  ;;  %v663_v4 = vpack.c.bf16 %v338_v3, %v337_v2  ;;  %v340_v6 = vld [vmem:[%s970_s7 + $0x38] sm:$0xff]  ;;  %v341_v8 = vld [vmem:[%s970_s7 + $0x40] sm:$0xff]  ;;  %v342_v9 = vld [vmem:[%s970_s7 + $0x48] sm:$0xff] }
  0x35   :  { %v666_v7 = vpack.c.bf16 %v340_v6, %v339_v5  ;;  %v669_v10 = vpack.c.bf16 %v342_v9, %v341_v8  ;;  %v343_v11 = vld [vmem:[%s970_s7 + $0x50] sm:$0xff]  ;;  %v344_v12 = vld [vmem:[%s970_s7 + $0x58] sm:$0xff]  ;;  %v345_v14 = vld [vmem:[%s970_s7 + $0x60] sm:$0xff] }
  0x36   :  { %619 = vmatpush3.bf16.msra.mxu1 %v618_v17  ;;  %v672_v13 = vpack.c.bf16 %v344_v12, %v343_v11  ;;  %v346_v15 = vld [vmem:[%s970_s7 + $0x68] sm:$0xff]  ;;  %v436_v17 = vld [vmem:[%s967_s4] ss:$0 sm:$0xff]  ;;  %v347_v22 = vld [vmem:[%s970_s7 + $0x70] sm:$0xff] }
  0x37   :  { %620 = vmatprep.subr.bf16.mxu1 %v739_v0  ;;  %640 = vmatpush3.bf16.msra.mxu0 %v639_v38  ;;  %v675_v16 = vpack.c.bf16 %v346_v15, %v345_v14 }
  0x38   :  { %641 = vmatprep.subr.bf16.mxu0 %v739_v0 }
  0x3a   :  { %622 = vmatpush3.bf16.msra.mxu1 %v621_v20 }
  0x3b   :  { %623 = vmatprep.subr.bf16.mxu1 %v739_v0  ;;  %643 = vmatpush3.bf16.msra.mxu0 %v642_v41 }
  0x3c   :  { %644 = vmatprep.subr.bf16.mxu0 %v739_v0 }
  0x3e   :  { %625 = vmatpush3.bf16.msra.mxu1 %v624_v23  ;;  %v348_v23 = vld [vmem:[%s970_s7 + $0x78] sm:$0xff] }
  0x3f   :  { %626 = vmatprep.subr.bf16.mxu1 %v739_v0  ;;  %646 = vmatpush3.bf16.msra.mxu0 %v645_v44  ;;  %v678_v24 = vpack.c.bf16 %v348_v23, %v347_v22 }
  0x40   :  { %647 = vmatprep.subr.bf16.mxu0 %v739_v0 }
  0x42   :  { %628 = vmatpush3.bf16.msra.mxu1 %v627_v26 }
  0x43   :  { %629 = vmatprep.subr.bf16.mxu1 %v739_v0  ;;  %649 = vmatpush3.bf16.msra.mxu0 %v648_v47 }
  0x44   :  { %650 = vmatprep.subr.bf16.mxu0 %v739_v0 }
  0x46   :  { %631 = vmatpush3.bf16.msra.mxu1 %v630_v29  ;;  %v438_v29 = vld [vmem:[%s971_s8] ss:$0 sm:$0xff] }
  0x47   :  { %656 = vmatprep.subr.bf16.mxu1 %v739_v0  ;;  %652 = vmatpush3.bf16.msra.mxu0 %v651_v50 }
  0x48   :  { %653 = vmatprep.subr.bf16.mxu0 %v739_v0 }
  0x4b   :  { %655 = vmatpush3.bf16.msra.mxu0 %v654_v58 }
  0xff   :  { %v140_v52 = vpop.f32.mrb[0].mxu0 }
 0x100   :  { %v141_v53 = vadd.f32 %v434_v51, %v140_v52  ;;  %v499_v54 = vpop.f32.mrb[1].mxu0 }
 0x102   :  { %v144_v55 = vmax.f32 %v141_v53, 0.0 }
 0x104   :  { %533 = vmatmul.mubr.f32.vlgmr.msra.gmra.mrb[0].mxu1 %v144_v55 }
 0x105   :  { %602 = vmatprep.mubr.msk.f32.mxu1 %vm740_vm0, %v741_v1  ;;  %658 = vmatpush3.bf16.msra.mxu1 %v657_v62  ;;  %v660_v1 = vpack.c.bf16 %v336_v63, %v335_v61 }
 0x106   :  { %659 = vmatprep.subr.bf16.mxu1 %v739_v0 }
 0x109   :  { %661 = vmatpush3.bf16.msra.mxu1 %v660_v1 }
 0x10a   :  { %662 = vmatprep.subr.bf16.mxu1 %v739_v0 }
 0x10d   :  { %664 = vmatpush3.bf16.msra.mxu1 %v663_v4 }
 0x10e   :  { %665 = vmatprep.subr.bf16.mxu1 %v739_v0 }
 0x111   :  { %667 = vmatpush3.bf16.msra.mxu1 %v666_v7 }
 0x112   :  { %668 = vmatprep.subr.bf16.mxu1 %v739_v0 }
 0x115   :  { %670 = vmatpush3.bf16.msra.mxu1 %v669_v10 }
 0x116   :  { %671 = vmatprep.subr.bf16.mxu1 %v739_v0 }
 0x119   :  { %673 = vmatpush3.bf16.msra.mxu1 %v672_v13 }
 0x11a   :  { %674 = vmatprep.subr.bf16.mxu1 %v739_v0 }
 0x11d   :  { %676 = vmatpush3.bf16.msra.mxu1 %v675_v16 }
 0x11e   :  { %677 = vmatprep.subr.bf16.mxu1 %v739_v0  ;;  %v437_v0 = vld [vmem:[%s969_s6] ss:$0 sm:$0xff] }
 0x121   :  { %679 = vmatpush3.bf16.msra.mxu1 %v678_v24 }
 0x1d7   :  { %v234_v18 = vpop.f32.mrb[0].mxu1 }
 0x1d8   :  { %v235_v19 = vadd.f32 %v436_v17, %v234_v18  ;;  %v534_v20 = vpop.f32.mrb[1].mxu1 }
 0x1da   :  { %v238_v21 = vmax.f32 %v235_v19, 0.0 }
 0x1dc   :  { %568 = vmatmul.mubr.f32.vlgmr.msra.gmra.mrb[2].mxu0 %v238_v21 }
 0x2af   :  { %v328_v25 = vpop.f32.mrb[2].mxu0 }
 0x2b0   :  { %v329_v26 = vadd.f32 %v437_v0, %v328_v25  ;;  %v569_v27 = vpop.f32.mrb[3].mxu0 }
 0x2b2   :  { %v332_v28 = vmax.f32 %v329_v26, 0.0 }
 0x2b4   :  { %603 = vmatmul.mubr.f32.vlgmr.msra.gmra.mrb[2].mxu1 %v332_v28 }
 0x387   :  { %v422_v30 = vpop.f32.mrb[2].mxu1 }
 0x388   :  { %v423_v31 = vadd.f32 %v438_v29, %v422_v30  ;;  %v604_v32 = vpop.f32.mrb[3].mxu1 }
 0x38a   :  { %427 = vst.msk [vmem:[%s972_s9] sm:$0xff] %vm426_vm2, %v423_v31 }
 0x38b   :  { %432 = vsyncpa [#allocation3], 1 }
 0x38c   :  { %433 = vsyncpa [#allocation5], 1 }

</bundles_post_ra>
